<compile_context>
chip_gen: v7x
topology: tpu7x:2x2x1
jax: 0.10.0
libtpu: 0.0.40
codegen_flags: <defaults>
</compile_context>

<pallas_src>
import functools

import jax
import jax.numpy as jnp
from jax import lax
from jax.experimental import pallas as pl
from jax.experimental.pallas import tpu as pltpu


def _spa_kernel(a_h_ref, dh_u_ref, dh_d_ref, a_w_ref, dw_l_ref, dw_r_ref,
                org_ref, enh_ref, out_ref, *, contrast, hp8, wp128):
    """One batch element per grid step.

    org_ref/enh_ref : (1, C, H, W) f32 blocks of the raw inputs.
    a_h/dh_u/dh_d   : (hp8, H)   row pool / (pool - shifted-pool) selectors (0/1).
    a_w/dw_l/dw_r   : (W, wp128) column pool / (pool - shifted-pool) selectors,
                      carrying the 1/(16*C) channel-mean + avg-pool scale.
    out_ref         : (1, 8, 128) lane-dense partial sum for this batch element.
    """
    # Linear fusion of the channel mean + contrast combine (scale folded into a_w).
    m = (contrast * jnp.sum(org_ref[...], axis=(0, 1))
         - jnp.sum(enh_ref[...], axis=(0, 1)))                           # (H, W)

    # Column pooling (and column-shifted variants): lane-dense (wp128) outputs.
    q   = jnp.dot(m, a_w_ref[...],  preferred_element_type=jnp.float32)  # (H, wp128)
    q_l = jnp.dot(m, dw_l_ref[...], preferred_element_type=jnp.float32)
    q_r = jnp.dot(m, dw_r_ref[...], preferred_element_type=jnp.float32)

    # Row pooling -> the four zero-padded directional stencil responses
    # D_dir = conv2d(contrast*org_pool - enh_pool, k_dir, padding=1) on an
    # (hp8, wp128) lane-dense tile; exact zeros outside the valid Hp x Wp region.
    d_left  = jnp.dot(a_h_ref[...],  q_l, preferred_element_type=jnp.float32)
    d_right = jnp.dot(a_h_ref[...],  q_r, preferred_element_type=jnp.float32)
    d_up    = jnp.dot(dh_u_ref[...], q,   preferred_element_type=jnp.float32)
    d_down  = jnp.dot(dh_d_ref[...], q,   preferred_element_type=jnp.float32)

    d = (d_left * d_left + d_right * d_right
         + d_up * d_up + d_down * d_down)                                # (hp8, wp128)

    # Fold to a single (8, 128) vreg-aligned partial (static, tile-aligned slices);
    # the cross-lane reduction of this tiny slab happens once in the wrapper.
    acc = jnp.zeros((8, 128), jnp.float32)
    for r in range(hp8 // 8):
        for cb in range(wp128 // 128):
            acc = acc + d[r * 8:(r + 1) * 8, cb * 128:(cb + 1) * 128]
    out_ref[0] = acc


def _stencil_matrices(h, w, c, hp, wp, hp8, wp128):
    """Constant selectors encoding AvgPool2d(4), the 1/C channel mean, the
    zero-padded +/-1 stencils and the lane-dense (hp8, wp128) padding."""
    scale = 1.0 / (16.0 * c)

    ih = jnp.arange(hp8)[:, None]            # pooled row index      (hp8, 1)
    kh = jnp.arange(h)[None, :] // 4         # source row -> pooled  (1, H)
    a_h   = (kh == ih).astype(jnp.float32)                                  # center
    a_h_u = ((ih >= 1) & (ih < hp) & (kh == ih - 1)).astype(jnp.float32)    # up nbr
    a_h_d = ((ih <= hp - 2) & (kh == ih + 1)).astype(jnp.float32)           # down nbr

    jw = jnp.arange(wp128)[None, :]          # pooled col index      (1, wp128)
    kw = jnp.arange(w)[:, None] // 4         # source col -> pooled  (W, 1)
    a_w   = (kw == jw).astype(jnp.float32) * scale
    a_w_l = ((jw >= 1) & (jw < wp) & (kw == jw - 1)).astype(jnp.float32) * scale
    a_w_r = ((jw <= wp - 2) & (kw == jw + 1)).astype(jnp.float32) * scale

    return a_h, a_h - a_h_u, a_h - a_h_d, a_w, a_w - a_w_l, a_w - a_w_r


def l_spa(org, enhance, contrast=8):
    """Pallas implementation of L_spa.forward(org, enhance, contrast)."""
    b, c, h, w = org.shape
    assert h % 4 == 0 and w % 4 == 0, "AvgPool2d(4) requires H, W divisible by 4"
    hp, wp = h // 4, w // 4
    hp8 = ((hp + 7) // 8) * 8          # lane-dense working extents
    wp128 = ((wp + 127) // 128) * 128

    org = org.astype(jnp.float32)
    enhance = enhance.astype(jnp.float32)
    mats = _stencil_matrices(h, w, c, hp, wp, hp8, wp128)

    kern = functools.partial(_spa_kernel, contrast=float(contrast),
                             hp8=hp8, wp128=wp128)

    # One batch element per grid step bounds VMEM to ~2 inputs x 2 buffers x C*H*W*4B.
    # TODO(synk): add a row-tiled grid axis (with 1-row pooled halo) for very large images.
    partials = pl.pallas_call(
        kern,
        out_shape=jax.ShapeDtypeStruct((b, 8, 128), jnp.float32),
        grid_spec=pltpu.PrefetchScalarGridSpec(
            num_scalar_prefetch=0,
            grid=(b,),
            in_specs=[
                pl.BlockSpec((hp8, h), lambda i: (0, 0)),
                pl.BlockSpec((hp8, h), lambda i: (0, 0)),
                pl.BlockSpec((hp8, h), lambda i: (0, 0)),
                pl.BlockSpec((w, wp128), lambda i: (0, 0)),
                pl.BlockSpec((w, wp128), lambda i: (0, 0)),
                pl.BlockSpec((w, wp128), lambda i: (0, 0)),
                pl.BlockSpec((1, c, h, w), lambda i: (i, 0, 0, 0)),
                pl.BlockSpec((1, c, h, w), lambda i: (i, 0, 0, 0)),
            ],
            out_specs=pl.BlockSpec((1, 8, 128), lambda i: (i, 0, 0)),
        ),
        compiler_params=pltpu.CompilerParams(
            dimension_semantics=("parallel",)),
    )(*mats, org, enhance)

    # torch.mean(E) with E of shape (B, 1, Hp, Wp); padded lanes are exact zeros.
    return jnp.sum(partials) / (b * hp * wp)


# ---------------- pure-JAX reference (mirrors the PyTorch module) ----------------
def l_spa_ref(org, enhance, contrast=8):
    b, c, h, w = org.shape
    k_left = jnp.array([[0, 0, 0], [-1, 1, 0], [0, 0, 0]], jnp.float32)[None, None]
    k_right = jnp.array([[0, 0, 0], [0, 1, -1], [0, 0, 0]], jnp.float32)[None, None]
    k_up = jnp.array([[0, -1, 0], [0, 1, 0], [0, 0, 0]], jnp.float32)[None, None]
    k_down = jnp.array([[0, 0, 0], [0, 1, 0], [0, -1, 0]], jnp.float32)[None, None]

    om = jnp.mean(org.astype(jnp.float32), axis=1, keepdims=True)
    em = jnp.mean(enhance.astype(jnp.float32), axis=1, keepdims=True)

    def pool(x):
        return x.reshape(b, 1, h // 4, 4, w // 4, 4).mean(axis=(3, 5))

    op, ep = pool(om), pool(em)

    def conv(x, k):
        return lax.conv_general_dilated(
            x, k, window_strides=(1, 1), padding=((1, 1), (1, 1)),
            dimension_numbers=("NCHW", "OIHW", "NCHW"))

    e = 0.0
    for k in (k_left, k_right, k_up, k_down):
        e = e + (conv(op, k) * contrast - conv(ep, k)) ** 2
    return jnp.mean(e)


if __name__ == "__main__":
    key = jax.random.PRNGKey(0)
    k1, k2 = jax.random.split(key)
    org = jax.random.uniform(k1, (2, 3, 32, 32), dtype=jnp.float32)
    enh = jax.random.uniform(k2, (2, 3, 32, 32), dtype=jnp.float32)

    out = jax.block_until_ready(l_spa(org, enh, contrast=8))
    ref = l_spa_ref(org, enh, contrast=8)
    assert jnp.allclose(out, ref, atol=1e-4, rtol=1e-4), (out, ref)

    print("KERNEL_OK")
</pallas_src>

<mosaic_0001>
module attributes {stable_mosaic.version = 11 : i64} {
  func.func @_spa_kernel(%arg0: i32, %arg1: memref<8x32xf32, #tpu.memory_space<vmem>>, %arg2: memref<8x32xf32, #tpu.memory_space<vmem>>, %arg3: memref<8x32xf32, #tpu.memory_space<vmem>>, %arg4: memref<32x128xf32, #tpu.memory_space<vmem>>, %arg5: memref<32x128xf32, #tpu.memory_space<vmem>>, %arg6: memref<32x128xf32, #tpu.memory_space<vmem>>, %arg7: memref<1x3x32x32xf32, #tpu.memory_space<vmem>>, %arg8: memref<1x3x32x32xf32, #tpu.memory_space<vmem>>, %arg9: memref<1x8x128xf32, #tpu.memory_space<vmem>>) attributes {dimension_semantics = [#tpu.dimension_semantics<parallel>], iteration_bounds = array<i64: 2>, scalar_prefetch = 0 : i64, scratch_operands = 0 : i64, tpu.core_type = #tpu.core_type<tc>, window_params = [{pipeline_mode = #tpu.pipeline_mode<synchronous>, transform_indices = @transform_0, window_bounds = array<i64: 8, 32>}, {pipeline_mode = #tpu.pipeline_mode<synchronous>, transform_indices = @transform_1, window_bounds = array<i64: 8, 32>}, {pipeline_mode = #tpu.pipeline_mode<synchronous>, transform_indices = @transform_2, window_bounds = array<i64: 8, 32>}, {pipeline_mode = #tpu.pipeline_mode<synchronous>, transform_indices = @transform_3, window_bounds = array<i64: 32, 128>}, {pipeline_mode = #tpu.pipeline_mode<synchronous>, transform_indices = @transform_4, window_bounds = array<i64: 32, 128>}, {pipeline_mode = #tpu.pipeline_mode<synchronous>, transform_indices = @transform_5, window_bounds = array<i64: 32, 128>}, {transform_indices = @transform_6, window_bounds = array<i64: 1, 3, 32, 32>}, {transform_indices = @transform_7, window_bounds = array<i64: 1, 3, 32, 32>}, {transform_indices = @transform_8, window_bounds = array<i64: 1, 8, 128>}]} {
    %c0 = arith.constant 0 : index
    %c0_0 = arith.constant 0 : index
    %c0_1 = arith.constant 0 : index
    %c0_2 = arith.constant 0 : index
    %0 = vector.load %arg7[%c0, %c0_0, %c0_1, %c0_2] : memref<1x3x32x32xf32, #tpu.memory_space<vmem>>, vector<1x3x32x32xf32>
    %cst = arith.constant dense<0.000000e+00> : vector<32x32xf32>
    %1 = vector.multi_reduction <add>, %0, %cst [0, 1] : vector<1x3x32x32xf32> to vector<32x32xf32>
    %cst_3 = arith.constant 8.000000e+00 : f32
    %2 = vector.broadcast %cst_3 : f32 to vector<32x32xf32>
    %3 = arith.mulf %2, %1 : vector<32x32xf32>
    %c0_4 = arith.constant 0 : index
    %c0_5 = arith.constant 0 : index
    %c0_6 = arith.constant 0 : index
    %c0_7 = arith.constant 0 : index
    %4 = vector.load %arg8[%c0_4, %c0_5, %c0_6, %c0_7] : memref<1x3x32x32xf32, #tpu.memory_space<vmem>>, vector<1x3x32x32xf32>
    %cst_8 = arith.constant dense<0.000000e+00> : vector<32x32xf32>
    %5 = vector.multi_reduction <add>, %4, %cst_8 [0, 1] : vector<1x3x32x32xf32> to vector<32x32xf32>
    %6 = arith.subf %3, %5 : vector<32x32xf32>
    %c0_9 = arith.constant 0 : index
    %c0_10 = arith.constant 0 : index
    %7 = vector.load %arg4[%c0_9, %c0_10] : memref<32x128xf32, #tpu.memory_space<vmem>>, vector<32x128xf32>
    %cst_11 = arith.constant dense<0.000000e+00> : vector<32x128xf32>
    %8 = tpu.matmul %6, %7, %cst_11 {dimension_numbers = #tpu.dot_dimension_numbers<[1], [0], [0], [1], [0, 0, 1, 1], [], []>} : vector<32x32xf32>, vector<32x128xf32>, vector<32x128xf32> -> vector<32x128xf32>
    %c0_12 = arith.constant 0 : index
    %c0_13 = arith.constant 0 : index
    %9 = vector.load %arg5[%c0_12, %c0_13] : memref<32x128xf32, #tpu.memory_space<vmem>>, vector<32x128xf32>
    %cst_14 = arith.constant dense<0.000000e+00> : vector<32x128xf32>
    %10 = tpu.matmul %6, %9, %cst_14 {dimension_numbers = #tpu.dot_dimension_numbers<[1], [0], [0], [1], [0, 0, 1, 1], [], []>} : vector<32x32xf32>, vector<32x128xf32>, vector<32x128xf32> -> vector<32x128xf32>
    %c0_15 = arith.constant 0 : index
    %c0_16 = arith.constant 0 : index
    %11 = vector.load %arg6[%c0_15, %c0_16] : memref<32x128xf32, #tpu.memory_space<vmem>>, vector<32x128xf32>
    %cst_17 = arith.constant dense<0.000000e+00> : vector<32x128xf32>
    %12 = tpu.matmul %6, %11, %cst_17 {dimension_numbers = #tpu.dot_dimension_numbers<[1], [0], [0], [1], [0, 0, 1, 1], [], []>} : vector<32x32xf32>, vector<32x128xf32>, vector<32x128xf32> -> vector<32x128xf32>
    %c0_18 = arith.constant 0 : index
    %c0_19 = arith.constant 0 : index
    %13 = vector.load %arg1[%c0_18, %c0_19] : memref<8x32xf32, #tpu.memory_space<vmem>>, vector<8x32xf32>
    %cst_20 = arith.constant dense<0.000000e+00> : vector<8x128xf32>
    %14 = tpu.matmul %13, %10, %cst_20 {dimension_numbers = #tpu.dot_dimension_numbers<[1], [0], [0], [1], [0, 0, 1, 1], [], []>} : vector<8x32xf32>, vector<32x128xf32>, vector<8x128xf32> -> vector<8x128xf32>
    %c0_21 = arith.constant 0 : index
    %c0_22 = arith.constant 0 : index
    %15 = vector.load %arg1[%c0_21, %c0_22] : memref<8x32xf32, #tpu.memory_space<vmem>>, vector<8x32xf32>
    %cst_23 = arith.constant dense<0.000000e+00> : vector<8x128xf32>
    %16 = tpu.matmul %15, %12, %cst_23 {dimension_numbers = #tpu.dot_dimension_numbers<[1], [0], [0], [1], [0, 0, 1, 1], [], []>} : vector<8x32xf32>, vector<32x128xf32>, vector<8x128xf32> -> vector<8x128xf32>
    %c0_24 = arith.constant 0 : index
    %c0_25 = arith.constant 0 : index
    %17 = vector.load %arg2[%c0_24, %c0_25] : memref<8x32xf32, #tpu.memory_space<vmem>>, vector<8x32xf32>
    %cst_26 = arith.constant dense<0.000000e+00> : vector<8x128xf32>
    %18 = tpu.matmul %17, %8, %cst_26 {dimension_numbers = #tpu.dot_dimension_numbers<[1], [0], [0], [1], [0, 0, 1, 1], [], []>} : vector<8x32xf32>, vector<32x128xf32>, vector<8x128xf32> -> vector<8x128xf32>
    %c0_27 = arith.constant 0 : index
    %c0_28 = arith.constant 0 : index
    %19 = vector.load %arg3[%c0_27, %c0_28] : memref<8x32xf32, #tpu.memory_space<vmem>>, vector<8x32xf32>
    %cst_29 = arith.constant dense<0.000000e+00> : vector<8x128xf32>
    %20 = tpu.matmul %19, %8, %cst_29 {dimension_numbers = #tpu.dot_dimension_numbers<[1], [0], [0], [1], [0, 0, 1, 1], [], []>} : vector<8x32xf32>, vector<32x128xf32>, vector<8x128xf32> -> vector<8x128xf32>
    %21 = arith.mulf %14, %14 : vector<8x128xf32>
    %22 = arith.mulf %16, %16 : vector<8x128xf32>
    %23 = arith.addf %21, %22 : vector<8x128xf32>
    %24 = arith.mulf %18, %18 : vector<8x128xf32>
    %25 = arith.addf %23, %24 : vector<8x128xf32>
    %26 = arith.mulf %20, %20 : vector<8x128xf32>
    %27 = arith.addf %25, %26 : vector<8x128xf32>
    %cst_30 = arith.constant 0.000000e+00 : f32
    %28 = vector.broadcast %cst_30 : f32 to vector<8x128xf32>
    %29 = arith.addf %28, %27 : vector<8x128xf32>
    %c0_31 = arith.constant 0 : index
    %c0_32 = arith.constant 0 : index
    %c0_33 = arith.constant 0 : index
    %30 = vector.load %arg9[%c0_31, %c0_32, %c0_33] : memref<1x8x128xf32, #tpu.memory_space<vmem>>, vector<1x8x128xf32>
    %31 = vector.shape_cast %30 : vector<1x8x128xf32> to vector<8x128xf32>
    %32 = vector.shape_cast %29 : vector<8x128xf32> to vector<1x8x128xf32>
    tpu.vector_store %arg9[%c0_31, %c0_32, %c0_33], %32 {strides = array<i32>} : memref<1x8x128xf32, #tpu.memory_space<vmem>>, vector<1x8x128xf32>,
    return
  }
  func.func @transform_0(%arg0: i32) -> (i32, i32) {
    %c0_i32 = arith.constant 0 : i32
    %c0_i32_0 = arith.constant 0 : i32
    %c0_i32_1 = arith.constant 0 : i32
    return %c0_i32, %c0_i32_0 : i32, i32
  }
  func.func @transform_1(%arg0: i32) -> (i32, i32) {
    %c0_i32 = arith.constant 0 : i32
    %c0_i32_0 = arith.constant 0 : i32
    %c0_i32_1 = arith.constant 0 : i32
    return %c0_i32, %c0_i32_0 : i32, i32
  }
  func.func @transform_2(%arg0: i32) -> (i32, i32) {
    %c0_i32 = arith.constant 0 : i32
    %c0_i32_0 = arith.constant 0 : i32
    %c0_i32_1 = arith.constant 0 : i32
    return %c0_i32, %c0_i32_0 : i32, i32
  }
  func.func @transform_3(%arg0: i32) -> (i32, i32) {
    %c0_i32 = arith.constant 0 : i32
    %c0_i32_0 = arith.constant 0 : i32
    %c0_i32_1 = arith.constant 0 : i32
    return %c0_i32, %c0_i32_0 : i32, i32
  }
  func.func @transform_4(%arg0: i32) -> (i32, i32) {
    %c0_i32 = arith.constant 0 : i32
    %c0_i32_0 = arith.constant 0 : i32
    %c0_i32_1 = arith.constant 0 : i32
    return %c0_i32, %c0_i32_0 : i32, i32
  }
  func.func @transform_5(%arg0: i32) -> (i32, i32) {
    %c0_i32 = arith.constant 0 : i32
    %c0_i32_0 = arith.constant 0 : i32
    %c0_i32_1 = arith.constant 0 : i32
    return %c0_i32, %c0_i32_0 : i32, i32
  }
  func.func @transform_6(%arg0: i32) -> (i32, i32, i32, i32) {
    %c0_i32 = arith.constant 0 : i32
    %c0_i32_0 = arith.constant 0 : i32
    %c0_i32_1 = arith.constant 0 : i32
    %c0_i32_2 = arith.constant 0 : i32
    return %arg0, %c0_i32, %c0_i32_0, %c0_i32_1 : i32, i32, i32, i32
  }
  func.func @transform_7(%arg0: i32) -> (i32, i32, i32, i32) {
    %c0_i32 = arith.constant 0 : i32
    %c0_i32_0 = arith.constant 0 : i32
    %c0_i32_1 = arith.constant 0 : i32
    %c0_i32_2 = arith.constant 0 : i32
    return %arg0, %c0_i32, %c0_i32_0, %c0_i32_1 : i32, i32, i32, i32
  }
  func.func @transform_8(%arg0: i32) -> (i32, i32, i32) {
    %c0_i32 = arith.constant 0 : i32
    %c0_i32_0 = arith.constant 0 : i32
    %c0_i32_1 = arith.constant 0 : i32
    return %arg0, %c0_i32, %c0_i32_0 : i32, i32, i32
  }
}

</mosaic_0001>

<bundles_post_ra>
// kernel: tpu_custom_call.1
= control target key start
LH: loop header
LB: loop body
LE: loop exit
PB: predicated region body
PF: predicated region fallthrough
CT: control target
= control target key end

     0   :  { %s2420_s0 = inlined_call_operand.hbm [shape: f32[8,32], index: 0, kind: input, shape index: {}]   ;;  %s2421_s1 = inlined_call_operand.hbm [shape: f32[8,32], index: 1, kind: input, shape index: {}]   ;;  %s2422_s2 = inlined_call_operand.hbm [shape: f32[8,32], index: 2, kind: input, shape index: {}]   ;;  %s2423_s3 = inlined_call_operand.hbm [shape: f32[32,128], index: 3, kind: input, shape index: {}]   ;;  %s2424_s4 = inlined_call_operand.hbm [shape: f32[32,128], index: 4, kind: input, shape index: {}]   ;;  %s2425_s5 = inlined_call_operand.hbm [shape: f32[32,128], index: 5, kind: input, shape index: {}]   ;;  %s2426_s6 = inlined_call_operand.hbm [shape: f32[2,3,32,32], index: 6, kind: input, shape index: {}]   ;;  %s2427_s7 = inlined_call_operand.hbm [shape: f32[2,3,32,32], index: 7, kind: input, shape index: {}]   ;;  %s2428_s8 = inlined_call_operand.hbm [shape: f32[2,8,128], index: 8, kind: output, shape index: {}]  }
   0x1   :  { %2447 = sst [smem:[#allocation26_spill]] %s2420_s0 }
   0x2   :  { %2448 = sst [smem:[#allocation27_spill]] %s2421_s1 }
   0x3   :  { %2449 = sst [smem:[#allocation28_spill]] %s2423_s3 }
   0x4   :  { %2450 = sst [smem:[#allocation29_spill]] %s2426_s6 }
   0x5   :  { %13 = vsyncpa [#allocation3], 0 }
   0x6   :  { %14 = vsyncpa [#allocation6], 0 }
   0x7   :  { %15 = vsyncpa [#allocation9], 0 }
   0x8   :  { %16 = vsyncpa [#allocation12], 0 }
   0x9   :  { %17 = vsyncpa [#allocation4], 0 }
   0xa   :  { %19 = vsyncpa [#allocation4 + $0x1], 0  ;;  %s1964_s27 = smov 0   ;;  %s1966_s28 = smov 0  }
   0xb   :  { %s1968_s29 = smov 0   ;;  %s1970_s30 = smov 0  }
   0xc LB: > { %2451 = sst [smem:[#allocation22_spill]] %s1899_s29  ;;  %s1905_s9 = smov [#allocation2]   ;;  %s1903_s30 = sphi %s1970_s30, %s2488_s30   ;;  %s1899_s29 = sphi %s1968_s29, %s2490_s29   ;;  %s1895_s28 = sphi %s1966_s28, %s2492_s28   ;;  %s1891_s27 = sphi %s1964_s27, %s2491_s27  }
   0xd   : > { %s247_s10 = sshll.u32 %s1905_s9, 4  ;;  %s1985_s11 = sadd.s32 4294967295, %s1903_s30   ;;  %s248_s10 = int_to_ptr.vmem [resolvable:$true] %s247_s10 }
   0xe   : > { %p1255_p0 = scmp.ge.s32.totalorder %s1903_s30, 1  ;;  %p2429_p1 = scmp.eq.s32.totalorder %s1985_s11, 0 }
   0xf   : > { %p234_p2 = scmp.lt.s32.totalorder %s1903_s30, 3  ;;  %s1906_s13 = smov [#allocation5]  }
  0x10   : > { %s258_s14 = sshll.u32 %s1906_s13, 4  ;;  %s1907_s15 = smov [#allocation8]   ;;  %s1997_s14 = int_to_ptr.vmem [resolvable:$true] %s258_s14 }
  0x11   : > { %p1990_p3 = pnand %p1255_p0, %p234_p2  ;;  %s279_s16 = sshll.u32 %s1907_s15, 4  ;;  %s2005_s16 = int_to_ptr.vmem [resolvable:$true] %s279_s16 }
  0x12   : > { %s2454_s0 = sld [smem:[#allocation26_spill]] }
  0x13   : > { %s2452_s12 = scalar_select %p1990_p3, 1, 0 }
  0x14   : > { %p1506_p5 = pneg %p1990_p3 }
  0x16   : > { %p2001_p6 = pnand %p1506_p5, %p2429_p1 }
  0x18   : > { %s2453_s17 = scalar_select %p2001_p6, 1, 0 }
  0x19   : > { %s1593_s20 = scalar_lea.hbm %s2454_s0, 128  ;;  %p2015_p8 = pneg %p2001_p6 }
  0x1a   : > { %p1594_p7 = scmp.ne.s32.totalorder %s2454_s0, %s1593_s20  ;;  %p1600_p11 = scmp.lt.u32.totalorder %s1593_s20, %s2454_s0 }
  0x1c   : > { %p1596_p9 = pnand %p2015_p8, %p1594_p7 }
  0x1e   : > { %p1597_p10 = pneg %p1596_p9 }
  0x20   : > { %p1602_p12 = pnand %p1600_p11, %p1597_p10 }
  0x22   : > { %1605 = shalt.err (!%p1602_p12)
}
  0x23   : > { %s1606_s26 = scalar_lea.vmem %s248_s10, 128  ;;  %p1614_p5 = scmp.lt.s32.totalorder %s248_s10, %s248_s10 }
  0x24   : > { %p1607_p13 = scmp.ne.s32.totalorder %s248_s10, %s1606_s26  ;;  %p1615_p4 = scmp.lt.s32.totalorder %s1606_s26, %s1606_s26 }
  0x26   : > { %p1609_p0 = pnand %p1607_p13, %p2015_p8  ;;  %p1616_p1 = por %p1615_p4, %p1614_p5 }
  0x28   : > { %p1610_p2 = pneg %p1609_p0 }
  0x2a   : > { %p1617_p3 = pnand %p1616_p1, %p1610_p2 }
  0x2c   : > { %1620 = shalt.err (!%p1617_p3)
}
  0x2d   : > { %1509 = dma.hbm_to_vmem [thread:$0]  (!%p2001_p6), %s2454_s0, 128, %s248_s10, [#allocation3]  }
  0x2e   : > { %s2456_s1 = sld [smem:[#allocation27_spill]] }
  0x34   : > { %s1621_s19 = scalar_lea.hbm %s2456_s1, 128 }
  0x35   : > { %p1622_p7 = scmp.ne.s32.totalorder %s2456_s1, %s1621_s19  ;;  %p1628_p1 = scmp.lt.u32.totalorder %s1621_s19, %s2456_s1 }
  0x37   : > { %p1624_p9 = pnand %p1622_p7, %p2015_p8 }
  0x39   : > { %p1625_p4 = pneg %p1624_p9 }
  0x3b   : > { %p1630_p3 = pnand %p1628_p1, %p1625_p4 }
  0x3d   : > { %1633 = shalt.err (!%p1630_p3)
}
  0x3e   : > { %s1634_s10 = scalar_lea.vmem %s1997_s14, 128  ;;  %p1642_p13 = scmp.lt.s32.totalorder %s1997_s14, %s1997_s14 }
  0x3f   : > { %p1635_p10 = scmp.ne.s32.totalorder %s1997_s14, %s1634_s10  ;;  %p1643_p0 = scmp.lt.s32.totalorder %s1634_s10, %s1634_s10 }
  0x41   : > { %p1637_p11 = pnand %p1635_p10, %p2015_p8  ;;  %p1644_p2 = por %p1643_p0, %p1642_p13 }
  0x43   : > { %p1638_p12 = pneg %p1637_p11 }
  0x45   : > { %p1645_p5 = pnand %p1644_p2, %p1638_p12 }
  0x47   : > { %1648 = shalt.err (!%p1645_p5)
}
  0x48   : > { %1512 = dma.hbm_to_vmem [thread:$0]  (!%p2001_p6), %s2456_s1, 128, %s1997_s14, [#allocation6]  }
  0x49   : > { %s2457_s3 = sld [smem:[#allocation28_spill]] }
  0x4f   : > { %s1649_s15 = scalar_lea.hbm %s2457_s3, 512 }
  0x50   : > { %p1650_p7 = scmp.ne.s32.totalorder %s2457_s3, %s1649_s15  ;;  %p1656_p1 = scmp.lt.u32.totalorder %s1649_s15, %s2457_s3 }
  0x52   : > { %p1652_p9 = pnand %p1650_p7, %p2015_p8 }
  0x54   : > { %p1653_p4 = pneg %p1652_p9 }
  0x56   : > { %p1658_p3 = pnand %p1656_p1, %p1653_p4 }
  0x58   : > { %1661 = shalt.err (!%p1658_p3)
}
  0x59   : > { %s1662_s14 = scalar_lea.vmem %s2005_s16, 512  ;;  %p1670_p13 = scmp.lt.s32.totalorder %s2005_s16, %s2005_s16 }
  0x5a   : > { %p1663_p10 = scmp.ne.s32.totalorder %s2005_s16, %s1662_s14  ;;  %p1671_p0 = scmp.lt.s32.totalorder %s1662_s14, %s1662_s14 }
  0x5c   : > { %p1665_p11 = pnand %p1663_p10, %p2015_p8  ;;  %p1672_p2 = por %p1671_p0, %p1670_p13 }
  0x5e   : > { %p1666_p12 = pneg %p1665_p11 }
  0x60   : > { %p1673_p5 = pnand %p1672_p2, %p1666_p12 }
  0x62   : > { %1676 = shalt.err (!%p1673_p5)
}
  0x63   : > { %s2431_s22 = smov 128   ;;  %s2433_s24 = smov 8  }
  0x64   : > { %1518 = dma.hbm_to_vmem [thread:$0]  (!%p2001_p6), %s2457_s3, 512, %s2005_s16, [#allocation9], %s2431_s22, %s2431_s22, %s2433_s24  }
  0x65   : > { %s1254_s26 = sadd.s32 4294967294, %s1903_s30   ;;  %s2082_s9 = sadd.s32 1, %s1903_s30  }
  0x66   : > { %2458 = sst [smem:[#allocation23_spill]] %s2082_s9  ;;  %s158_s13 = sadd.s32 1, %s1899_s29 }
  0x67   : > { %s155_s15 = ssub.s32 %s1903_s30, %s2082_s9  ;;  %p165_p7 = scmp.ne.s32.totalorder %s1899_s29, %s1895_s28 }
  0x68   : > { %p156_p9 = scmp.eq.s32.totalorder %s155_s15, 0  ;;  %p166_p4 = scmp.eq.s32.totalorder %s1903_s30, 0 }
  0x69   : > { %p171_p1 = scmp.ne.s32.totalorder %s1895_s28, %s1891_s27  ;;  %p221_p3 = scmp.eq.s32.totalorder %s1985_s11, 1 }
  0x6a   : > { %s2094_s18 = scalar_select %p156_p9, %s1899_s29, %s158_s13  }
  0x6b   : > { %p167_p10 = por %p166_p4, %p165_p7  ;;  %p2460_p11 = scmp.eq.s32.totalorder %s1985_s11, 0 }
  0x6c   : > { %2459 = sst [smem:[#allocation24_spill]] %s2094_s18  ;;  %p2102_p13 = por %p221_p3, %p165_p7 }
  0x6d   : > { %p2098_p12 = por %p2460_p11, %p171_p1  ;;  %p227_p0 = scmp.eq.s32.totalorder %s1254_s26, 1 }
  0x6e   : > { %s2462_s19 = scalar_select %p2102_p13, 1, 0 }
  0x6f   : > { %s2461_s16 = scalar_select %p2098_p12, 1, 0 }
  0x70   : > { %p1542_p2 = scmp.lt.s32.totalorder %s1903_s30, 2  ;;  %s319_s20 = sand.u32 1, %s1903_s30  }
  0x71   : > { %p2108_p5 = por %p227_p0, %p171_p1  ;;  %s321_s14 = sand.u32 1, %s1899_s29  }
  0x72   : > { %s2435_s10 = smul.u32 1536, %s1903_s30  ;;  %p2116_p9 = pnand %p1542_p2, %p167_p10 }
  0x73   : > { %s2463_s21 = scalar_select %p2108_p5, 1, 0 }
  0x74   : > { %s2114_s25 = smul.u32 96, %s321_s14  ;;  %s2466_s6 = sld [smem:[#allocation29_spill]] }
  0x75   : > { %2464 = sst [smem:[#allocation25_spill]] %s2463_s21  ;;  %s1910_s0 = smov [#allocation7]  }
  0x76   : > { %s2465_s13 = scalar_select %p2116_p9, 1, 0 }
  0x77   : > { %s323_s24 = scalar_lea.vmem [#allocation13], %s2114_s25  ;;  %s269_s1 = sshll.u32 %s1910_s0, 4  ;;  %s2130_s1 = int_to_ptr.vmem [resolvable:$true] %s269_s1 }
  0x78   : > { %s330_s14 = sshll.u32 %s323_s24, 4  ;;  %s2132_s3 = scalar_lea.sflag [#allocation3], %s319_s20  ;;  %s2128_s14 = int_to_ptr.vmem [resolvable:$true] %s330_s14 }
  0x79   : > { %p2444_p4 = pneg %p2116_p9 }
  0x7a   : > { %s2125_s26 = scalar_lea.hbm %s2466_s6, %s2435_s10  ;;  %s1682_s24 = scalar_lea.hbm %s2466_s6, 3072 }
  0x7b   : > { %s1677_s18 = scalar_lea.hbm %s2125_s26, 1536  ;;  %p1683_p10 = scmp.lt.u32.totalorder %s2125_s26, %s2466_s6 }
  0x7c   : > { %p1678_p7 = scmp.ne.s32.totalorder %s2125_s26, %s1677_s18  ;;  %p1684_p11 = scmp.lt.u32.totalorder %s1682_s24, %s1677_s18 }
  0x7d   : > { %p1686_p2 = scmp.lt.u32.totalorder %s1677_s18, %s2125_s26 }
  0x7e   : > { %p1680_p1 = pnand %p2444_p4, %p1678_p7  ;;  %p1685_p0 = por %p1684_p11, %p1683_p10 }
  0x80   : > { %p1681_p3 = pneg %p1680_p1  ;;  %p1687_p5 = por %p1686_p2, %p1685_p0 }
  0x82   : > { %p1688_p13 = pnand %p1687_p5, %p1681_p3 }
  0x84   : > { %1691 = shalt.err (!%p1688_p13)
}
  0x85   : > { %s1692_s20 = scalar_lea.vmem %s2128_s14, 1536  ;;  %s1911_s22 = smov [#allocation13]  }
  0x86   : > { %p1693_p7 = scmp.ne.s32.totalorder %s2128_s14, %s1692_s20  ;;  %s1697_s15 = sshll.u32 %s1911_s22, 4  ;;  %s1698_s15 = int_to_ptr.vmem [resolvable:$false] %s1697_s15 }
  0x87   : > { %s1699_s10 = scalar_lea.vmem %s1698_s15, 3072  ;;  %p1700_p6 = scmp.lt.s32.totalorder %s2128_s14, %s1698_s15 }
  0x88   : > { %p1695_p1 = pnand %p1693_p7, %p2444_p4  ;;  %p1701_p10 = scmp.lt.s32.totalorder %s1699_s10, %s1692_s20 }
  0x8a   : > { %p1696_p12 = pneg %p1695_p1  ;;  %p1702_p11 = por %p1701_p10, %p1700_p6 }
  0x8c   : > { %p1703_p0 = pnand %p1702_p11, %p1696_p12 }
  0x8e   : > { %1706 = shalt.err (!%p1703_p0)
}
  0x8f   : > { %s2467_s18 = smov 8   ;;  %s2468_s24 = smov 128  }
  0x90   : > { %1528 = dma.hbm_to_vmem [thread:$0]  (!%p2116_p9), %s2125_s26, 1536, %s2128_s14, %s2132_s3, %s2468_s24, %s2468_s24, %s2467_s18  }
  0x91   : > { %s1707_s22 = scalar_lea.hbm %s2422_s2, 128 }
  0x92   : > { %p1708_p6 = scmp.ne.s32.totalorder %s2422_s2, %s1707_s22  ;;  %p1714_p5 = scmp.lt.u32.totalorder %s1707_s22, %s2422_s2 }
  0x94   : > { %p1710_p12 = pnand %p1708_p6, %p2015_p8 }
  0x96   : > { %p1711_p13 = pneg %p1710_p12 }
  0x98   : > { %p1716_p3 = pnand %p1714_p5, %p1711_p13 }
  0x9a   : > { %1719 = shalt.err (!%p1716_p3)
}
  0x9b   : > { %s1720_s26 = scalar_lea.vmem %s2130_s1, 128  ;;  %p1728_p10 = scmp.lt.s32.totalorder %s2130_s1, %s2130_s1 }
  0x9c   : > { %p1721_p2 = scmp.ne.s32.totalorder %s2130_s1, %s1720_s26  ;;  %p1729_p11 = scmp.lt.s32.totalorder %s1720_s26, %s1720_s26 }
  0x9e   : > { %p1723_p7 = pnand %p1721_p2, %p2015_p8  ;;  %p1730_p0 = por %p1729_p11, %p1728_p10 }
  0xa0   : > { %p1724_p1 = pneg %p1723_p7 }
  0xa2   : > { %p1731_p6 = pnand %p1730_p0, %p1724_p1 }
  0xa4   : > { %1734 = shalt.err (!%p1731_p6)
}
  0xa5   : > { %p2469_p12 = scmp.ne.s32.totalorder %s2453_s17, 0  ;;  %s1912_s14 = smov [#allocation10]  }
  0xa6   : > { %s292_s0 = sshll.u32 %s1912_s14, 4  ;;  %s1913_s22 = smov [#allocation11]   ;;  %s293_s0 = int_to_ptr.vmem [resolvable:$true] %s292_s0 }
  0xa7   : > { %1515 = dma.hbm_to_vmem [thread:$0]  (!%p2469_p12), %s2422_s2, 128, %s2130_s1, [#allocation6]  }
  0xa8   : > { %s305_s15 = sshll.u32 %s1913_s22, 4  ;;  %s1735_s26 = scalar_lea.hbm %s2424_s4, 512  ;;  %s2186_s15 = int_to_ptr.vmem [resolvable:$true] %s305_s15 }
  0xa9   : > { %p1736_p13 = scmp.ne.s32.totalorder %s2424_s4, %s1735_s26  ;;  %p1742_p2 = scmp.lt.u32.totalorder %s1735_s26, %s2424_s4 }
  0xab   : > { %p1738_p5 = pnand %p1736_p13, %p2015_p8 }
  0xad   : > { %p1739_p3 = pneg %p1738_p5 }
  0xaf   : > { %p1744_p7 = pnand %p1742_p2, %p1739_p3 }
  0xb1   : > { %1747 = shalt.err (!%p1744_p7)
}
  0xb2   : > { %s1748_s29 = scalar_lea.vmem %s293_s0, 512  ;;  %p1756_p0 = scmp.lt.s32.totalorder %s293_s0, %s293_s0 }
  0xb3   : > { %p1749_p1 = scmp.ne.s32.totalorder %s293_s0, %s1748_s29  ;;  %p1757_p6 = scmp.lt.s32.totalorder %s1748_s29, %s1748_s29 }
  0xb5   : > { %p1751_p10 = pnand %p1749_p1, %p2015_p8  ;;  %p1758_p4 = por %p1757_p6, %p1756_p0 }
  0xb7   : > { %p1752_p11 = pneg %p1751_p10 }
  0xb9   : > { %p1759_p9 = pnand %p1758_p4, %p1752_p11 }
  0xbb   : > { %1762 = shalt.err (!%p1759_p9)
}
  0xbc   : > { %1521 = dma.hbm_to_vmem [thread:$0]  (!%p2469_p12), %s2424_s4, 512, %s293_s0, [#allocation9], %s2468_s24, %s2468_s24, %s2467_s18  }
  0xbd   : > { %s1763_s20 = scalar_lea.hbm %s2425_s5, 512 }
  0xbe   : > { %p1764_p13 = scmp.ne.s32.totalorder %s2425_s5, %s1763_s20  ;;  %p1770_p5 = scmp.lt.u32.totalorder %s1763_s20, %s2425_s5 }
  0xc0   : > { %p1766_p9 = pnand %p1764_p13, %p2015_p8 }
  0xc2   : > { %p1767_p4 = pneg %p1766_p9 }
  0xc4   : > { %p1772_p3 = pnand %p1770_p5, %p1767_p4 }
  0xc6   : > { %1775 = shalt.err (!%p1772_p3)
}
  0xc7   : > { %s1776_s0 = scalar_lea.vmem %s2186_s15, 512  ;;  %p1784_p10 = scmp.lt.s32.totalorder %s2186_s15, %s2186_s15 }
  0xc8   : > { %p1777_p2 = scmp.ne.s32.totalorder %s2186_s15, %s1776_s0  ;;  %p1785_p11 = scmp.lt.s32.totalorder %s1776_s0, %s1776_s0 }
  0xca   : > { %p1779_p7 = pnand %p1777_p2, %p2015_p8  ;;  %p1786_p0 = por %p1785_p11, %p1784_p10 }
  0xcc   : > { %p1780_p1 = pneg %p1779_p7 }
  0xce   : > { %p1787_p6 = pnand %p1786_p0, %p1780_p1 }
  0xd0   : > { %1790 = shalt.err (!%p1787_p6)
}
  0xd1   : > { %1524 = dma.hbm_to_vmem [thread:$0]  (!%p2469_p12), %s2425_s5, 512, %s2186_s15, [#allocation12], %s2468_s24, %s2468_s24, %s2467_s18  }
  0xd2   : > { %s2470_s23 = smul.u32 1536, %s1903_s30  ;;  %s344_s17 = scalar_lea.vmem [#allocation14], %s2114_s25 }
  0xd3   : > { %s351_s20 = sshll.u32 %s344_s17, 4  ;;  %p2471_p13 = scmp.ne.s32.totalorder %s2465_s13, 0  ;;  %s2243_s20 = int_to_ptr.vmem [resolvable:$true] %s351_s20 }
  0xd4   : > { %s2240_s22 = scalar_lea.hbm %s2427_s7, %s2470_s23  ;;  %s1796_s6 = scalar_lea.hbm %s2427_s7, 3072 }
  0xd5   : > { %s1791_s10 = scalar_lea.hbm %s2240_s22, 1536  ;;  %p2472_p9 = pneg %p2471_p13 }
  0xd6   : > { %p1792_p8 = scmp.ne.s32.totalorder %s2240_s22, %s1791_s10  ;;  %p1797_p5 = scmp.lt.u32.totalorder %s2240_s22, %s2427_s7 }
  0xd7   : > { %p1798_p3 = scmp.lt.u32.totalorder %s1796_s6, %s1791_s10  ;;  %p1800_p7 = scmp.lt.u32.totalorder %s1791_s10, %s2240_s22 }
  0xd8   : > { %p1794_p4 = pnand %p1792_p8, %p2472_p9 }
  0xd9   : > { %p1799_p2 = por %p1798_p3, %p1797_p5 }
  0xda   : > { %p1795_p12 = pneg %p1794_p4 }
  0xdb   : > { %p1801_p1 = por %p1800_p7, %p1799_p2 }
  0xdd   : > { %p1802_p10 = pnand %p1801_p1, %p1795_p12 }
  0xdf   : > { %1805 = shalt.err (!%p1802_p10)
}
  0xe0   : > { %s1806_s25 = scalar_lea.vmem %s2243_s20, 1536  ;;  %p2473_p0 = pmov %p2472_p9 }
  0xe1   : > { %p1807_p11 = scmp.ne.s32.totalorder %s2243_s20, %s1806_s25  ;;  %s1914_s29 = smov [#allocation14]  }
  0xe2   : > { %s1811_s9 = sshll.u32 %s1914_s29, 4  ;;  %s1812_s9 = int_to_ptr.vmem [resolvable:$false] %s1811_s9 }
  0xe3   : > { %p1809_p6 = pnand %p1807_p11, %p2473_p0  ;;  %s1813_s23 = scalar_lea.vmem %s1812_s9, 3072 }
  0xe4   : > { %p1814_p9 = scmp.lt.s32.totalorder %s2243_s20, %s1812_s9  ;;  %p1815_p4 = scmp.lt.s32.totalorder %s1813_s23, %s1806_s25 }
  0xe5   : > { %p1810_p8 = pneg %p1809_p6 }
  0xe6   : > { %p1816_p5 = por %p1815_p4, %p1814_p9 }
  0xe8   : > { %p1817_p3 = pnand %p1816_p5, %p1810_p8 }
  0xea   : > { %1820 = shalt.err (!%p1817_p3)
}
  0xeb   : > { %1531 = dma.hbm_to_vmem [thread:$0]  (!%p2471_p13), %s2240_s22, 1536, %s2243_s20, %s2132_s3, %s2468_s24, %s2468_s24, %s2467_s18  }
  0xec   : > { %p2474_p12 = scmp.ne.s32.totalorder %s2452_s12, 0 }
  0xed   : > { %p2475_p2 = scmp.eq.s32.totalorder (!%p2474_p12), %s1985_s11, 0 }
  0xee   : > { %363 = sbr.rel (%p2474_p12) target bundleno = 745 (0x2e9), region = 52 }
  0xf5   : > { %1866 = dma.done.wait (%p2475_p2), [#allocation3], 128   ;;  %p2476_p7 = pmov %p2475_p2 }
  0xf6   : > { %p2477_p1 = pmov %p2475_p2 }
  0xf7   : > { %1868 = vsyncadd (%p2476_p7), [#allocation3], 4294967168 }
  0xf8   : > { %1870 = dma.done.wait (%p2477_p1), [#allocation6], 256   ;;  %p2478_p10 = pmov %p2477_p1 }
  0xf9   : > { %p2479_p11 = pmov %p2477_p1 }
  0xfa   : > { %1872 = vsyncadd (%p2478_p10), [#allocation6], 4294967040 }
  0xfb   : > { %1874 = dma.done.wait (%p2479_p11), [#allocation9], 1024   ;;  %p2480_p13 = pmov %p2477_p1 }
  0xfc   : > { %p2481_p0 = pmov %p2477_p1 }
  0xfd   : > { %1876 = vsyncadd (%p2480_p13), [#allocation9], 4294966272 }
  0xfe   : > { %1878 = dma.done.wait (%p2481_p0), [#allocation12], 512   ;;  %p2482_p6 = pmov %p2481_p0 }
  0xff   : > { %s389_s3 = sand.u32 1, %s1985_s11   ;;  %s2292_s12 = sand.u32 1, %s1895_s28  }
 0x100   : > { %1880 = vsyncadd (%p2482_p6), [#allocation12], 4294966784  ;;  %s1475_s13 = smul.u32 96, %s2292_s12  ;;  %s390_s18 = scalar_lea.sflag [#allocation3], %s389_s3 }
 0x101   : > { %p2483_p8 = scmp.ne.s32.totalorder %s2461_s16, 0 }
 0x102   : > { %s2295_s24 = scalar_lea.vmem [#allocation13], %s1475_s13 }
 0x103   : > { %1882 = dma.done.wait (%p2483_p8), %s390_s18, 3072  }
 0x104   : > { %1884 = vsyncadd (%p2483_p8), %s390_s18, 4294964224  ;;  %v513_v0 = vld [vmem:[#allocation8] sm:$0xff]  ;;  %v514_v1 = vld [vmem:[#allocation8 + $0x8] sm:$0xff]  ;;  %vm452_vm0 = vcmask 261120   ;;  %s2305_s16 = scalar_lea.vmem [#allocation14], %s1475_s13  ;;  %vm1916_vm1 = vmmov 0  }
 0x105   : > { %v614_v2 = vld [vmem:[#allocation10] sm:$0xff]  ;;  %v1423_v3 = vpack.c.bf16 %v514_v1, %v513_v0  ;;  %v615_v4 = vld [vmem:[#allocation10 + $0x8] sm:$0xff]  ;;  %v515_v5 = vld [vmem:[#allocation8 + $0x10] sm:$0xff]  ;;  %s1272_s21 = sshll.u32 %s2292_s12, 3  ;;  %s1290_s14 = sshll.u32 %s1985_s11, 7 }
 0x106   : > { %v516_v6 = vld [vmem:[#allocation8 + $0x18] sm:$0xff]  ;;  %v1431_v7 = vpack.c.bf16 %v615_v4, %v614_v2  ;;  %v616_v9 = vld [vmem:[#allocation10 + $0x10] sm:$0xff]  ;;  %v440_v11 = vld [vmem:[%s2295_s24] sm:$0xff]  ;;  %s439_s22 = scalar_lea.vmem [#allocation15], %s1272_s21  ;;  %s2376_s15 = scalar_lea.hbm %s2428_s8, %s1290_s14 }
 0x107   : > { %v1427_v8 = vpack.c.bf16 %v516_v6, %v515_v5  ;;  %v617_v10 = vld [vmem:[#allocation10 + $0x18] sm:$0xff]  ;;  %1424 = vmatprep.subr.bf16.mxu0 %v1423_v3  ;;  %v444_v13 = vld [vmem:[%s2295_s24 + $0x20] sm:$0xff]  ;;  %v453_v15 = vsel %vm452_vm0, %v440_v11, 0.0  ;;  %v441_v22 = vld [vmem:[%s2295_s24 + $0x8] sm:$0xff]  ;;  %s1107_s17 = sshll.u32 %s439_s22, 4  ;;  %s1094_s26 = scalar_lea.sflag [#allocation4], %s2292_s12  ;;  %s2378_s17 = int_to_ptr.vmem [resolvable:$true] %s1107_s17 }
 0x108   : > { %v1435_v12 = vpack.c.bf16 %v617_v10, %v616_v9  ;;  %v448_v14 = vld [vmem:[%s2295_s24 + $0x40] sm:$0xff]  ;;  %1432 = vmatprep.subr.bf16.mxu1 %v1431_v7  ;;  %1426 = vmatpush3.bf16.msra.mxu0 %v1423_v3  ;;  %v454_v17 = vsel %vm452_vm0, %v444_v13, 0.0  ;;  %v445_v26 = vld [vmem:[%s2295_s24 + $0x28] sm:$0xff]  ;;  %v458_v28 = vsel %vm452_vm0, %v441_v22, 0.0  ;;  %v442_v42 = vld [vmem:[%s2295_s24 + $0x10] sm:$0xff]  ;;  %s1821_s6 = scalar_lea.vmem %s2378_s17, 128 }
 0x109   : > { %v477_v16 = vld [vmem:[%s2305_s16] sm:$0xff]  ;;  %v456_v18 = vsel %vm452_vm0, %v448_v14, 0.0  ;;  %1434 = vmatpush3.bf16.msra.mxu1 %v1431_v7  ;;  %1428 = vmatprep.subr.bf16.mxu0 %v1427_v8  ;;  %v455_v23 = vadd.f32 %v454_v17, %v453_v15  ;;  %v449_v27 = vld [vmem:[%s2295_s24 + $0x48] sm:$0xff]  ;;  %v459_v31 = vsel %vm452_vm0, %v445_v26, 0.0  ;;  %v446_v43 = vld [vmem:[%s2295_s24 + $0x30] sm:$0xff]  ;;  %v463_v48 = vsel %vm452_vm0, %v442_v42, 0.0  ;;  %p1822_p9 = scmp.ne.s32.totalorder %s2378_s17, %s1821_s6 }
 0x10a   : > { %v481_v19 = vld [vmem:[%s2305_s16 + $0x20] sm:$0xff]  ;;  %v489_v21 = vsel %vm452_vm0, %v477_v16, 0.0  ;;  %v478_v29 = vld [vmem:[%s2305_s16 + $0x8] sm:$0xff]  ;;  %1436 = vmatprep.subr.bf16.mxu1 %v1435_v12  ;;  %v461_v32 = vsel %vm452_vm0, %v449_v27, 0.0  ;;  %v460_v38 = vadd.f32 %v459_v31, %v458_v28  ;;  %v450_v47 = vld [vmem:[%s2295_s24 + $0x50] sm:$0xff]  ;;  %v464_v53 = vsel %vm452_vm0, %v446_v43, 0.0 }
 0x10b   : > { %v485_v20 = vld [vmem:[%s2305_s16 + $0x40] sm:$0xff]  ;;  %v490_v24 = vsel %vm452_vm0, %v481_v19, 0.0  ;;  %v482_v33 = vld [vmem:[%s2305_s16 + $0x28] sm:$0xff]  ;;  %v494_v35 = vsel %vm452_vm0, %v478_v29, 0.0  ;;  %v457_v37 = vadd.f32 %v456_v18, %v455_v23  ;;  %v479_v49 = vld [vmem:[%s2305_s16 + $0x10] sm:$0xff]  ;;  %v466_v54 = vsel %vm452_vm0, %v450_v47, 0.0 }
 0x10c   : > { %v492_v25 = vsel %vm452_vm0, %v485_v20, 0.0  ;;  %v491_v30 = vadd.f32 %v490_v24, %v489_v21  ;;  %v486_v34 = vld [vmem:[%s2305_s16 + $0x48] sm:$0xff]  ;;  %v703_v36 = vld [vmem:[#allocation11] sm:$0xff]  ;;  %v495_v39 = vsel %vm452_vm0, %v482_v33, 0.0  ;;  %1430 = vmatpush3.bf16.msra.mxu0 %v1427_v8  ;;  %v483_v50 = vld [vmem:[%s2305_s16 + $0x30] sm:$0xff]  ;;  %v462_v52 = vadd.f32 %v461_v32, %v460_v38  ;;  %p2484_p4 = scmp.ne.s32.totalorder %s2462_s19, 0 }
 0x10d   : > { %v497_v40 = vsel %vm452_vm0, %v486_v34, 0.0  ;;  %v704_v41 = vld [vmem:[#allocation11 + $0x8] sm:$0xff]  ;;  %v496_v45 = vadd.f32 %v495_v39, %v494_v35  ;;  %1438 = vmatpush3.bf16.msra.mxu1 %v1435_v12  ;;  %v473_v51 = vmul.f32 8.0, %v457_v37  ;;  %v487_v55 = vld [vmem:[%s2305_s16 + $0x50] sm:$0xff]  ;;  %v443_v56 = vld [vmem:[%s2295_s24 + $0x18] sm:$0xff]  ;;  %v465_v59 = vadd.f32 %v464_v53, %v463_v48  ;;  %s1918_s11 = smov [#allocation15]  }
 0x10e   : > { %v493_v44 = vadd.f32 %v492_v25, %v491_v30  ;;  %v1439_v46 = vpack.c.bf16 %v704_v41, %v703_v36  ;;  %v447_v57 = vld [vmem:[%s2295_s24 + $0x38] sm:$0xff]  ;;  %v499_v60 = vsel %vm452_vm0, %v479_v49, 0.0  ;;  %v500_v61 = vsel %vm452_vm0, %v483_v50, 0.0  ;;  %v705_v6 = vld [vmem:[#allocation11 + $0x10] sm:$0xff]  ;;  %v792_v41 = vld [vmem:[#allocation2] sm:$0xff]  ;;  %p1823_p5 = pnand %p1822_p9, %p2484_p4  ;;  %s1825_s1 = sshll.u32 %s1918_s11, 4  ;;  %s1826_s1 = int_to_ptr.vmem [resolvable:$false] %s1825_s1 }
 0x10f   : > { %v498_v58 = vadd.f32 %v497_v40, %v496_v45  ;;  %v451_v62 = vld [vmem:[%s2295_s24 + $0x58] sm:$0xff]  ;;  %v474_v2 = vmul.f32 8.0, %v462_v52  ;;  %v501_v3 = vadd.f32 %v500_v61, %v499_v60  ;;  %v502_v4 = vsel %vm452_vm0, %v487_v55, 0.0  ;;  %v936_v47 = vld [vmem:[#allocation5] sm:$0xff]  ;;  %s1827_s0 = scalar_lea.vmem %s1826_s1, 256  ;;  %p1828_p12 = scmp.lt.s32.totalorder %s2378_s17, %s1826_s1 }
 0x110   : > { %1440 = vmatprep.subr.bf16.mxu0 %v1439_v46  ;;  %v480_v63 = vld [vmem:[%s2305_s16 + $0x18] sm:$0xff]  ;;  %v509_v1 = vsub.f32 %v473_v51, %v493_v44  ;;  %v467_v8 = vadd.f32 %v466_v54, %v465_v59  ;;  %v468_v9 = vsel %vm452_vm0, %v443_v56, 0.0  ;;  %v469_v10 = vsel %vm452_vm0, %v447_v57, 0.0  ;;  %p1824_p3 = pneg %p1823_p5  ;;  %p1829_p2 = scmp.lt.s32.totalorder %s1827_s0, %s1821_s6 }
 0x111   : > { %v484_v0 = vld [vmem:[%s2305_s16 + $0x38] sm:$0xff]  ;;  %v471_v11 = vsel %vm452_vm0, %v451_v62, 0.0  ;;  %v510_v12 = vsub.f32 %v474_v2, %v498_v58  ;;  %v503_v13 = vadd.f32 %v502_v4, %v501_v3  ;;  %v470_v14 = vadd.f32 %v469_v10, %v468_v9 }
 0x112   : > { %v488_v5 = vld [vmem:[%s2305_s16 + $0x58] sm:$0xff]  ;;  %1345 = vmatprep.mubr.msk.f32.mxu0 %vm452_vm0, %v509_v1  ;;  %1359 = vmatprep.mubr.msk.f32.mxu1 %vm452_vm0, %v509_v1  ;;  %v504_v15 = vsel %vm452_vm0, %v480_v63, 0.0  ;;  %v475_v16 = vmul.f32 8.0, %v467_v8  ;;  %v505_v17 = vsel %vm452_vm0, %v484_v0, 0.0  ;;  %v1915_v26 = vmov 0.0|0.0   ;;  %p1830_p7 = por %p1829_p2, %p1828_p12 }
 0x113   : > { %v706_v7 = vld [vmem:[#allocation11 + $0x18] sm:$0xff]  ;;  %v507_v18 = vsel %vm452_vm0, %v488_v5, 0.0  ;;  %1346 = vmatmul.mubr.msk.f32.vlgmr.msra.gmra.mrb[0].mxu0 %vm452_vm0, %v510_v12  ;;  %1360 = vmatmul.mubr.msk.f32.vlgmr.msra.gmra.mrb[0].mxu1 %vm452_vm0, %v510_v12  ;;  %v472_v20 = vadd.f32 %v471_v11, %v470_v14  ;;  %v506_v21 = vadd.f32 %v505_v17, %v504_v15  ;;  %v1917_v27 = vmov 0.0  }
 0x114   : > { %v1443_v19 = vpack.c.bf16 %v706_v7, %v705_v6  ;;  %1442 = vmatpush3.bf16.msra.mxu0 %v1439_v46  ;;  %v511_v22 = vsub.f32 %v475_v16, %v503_v13  ;;  %1447 = vmatprep.subr.bf16.mxu1 %v1915_v26  ;;  %v1010_v48 = vld [vmem:[#allocation7] sm:$0xff]  ;;  %p1831_p1 = pnand %p1830_p7, %p1824_p3 }
 0x115   : > { %v476_v23 = vmul.f32 8.0, %v472_v20  ;;  %v508_v24 = vadd.f32 %v507_v18, %v506_v21 }
 0x116   : > { %1444 = vmatprep.subr.bf16.mxu0 %v1443_v19  ;;  %1348 = vmatprep.mubr.msk.f32.mxu0 %vm452_vm0, %v511_v22 }
 0x117   : > { %1362 = vmatprep.mubr.msk.f32.mxu1 %vm452_vm0, %v511_v22  ;;  %v512_v25 = vsub.f32 %v476_v23, %v508_v24 }
 0x118   : > { %1446 = vmatpush3.bf16.msra.mxu0 %v1443_v19 }
 0x119   : > { %1349 = vmatmul.mubr.msk.f32.gmra.mrb[2].mxu0 %vm452_vm0, %v512_v25  ;;  %1363 = vmatmul.mubr.msk.f32.gmra.mrb[2].mxu1 %vm452_vm0, %v512_v25 }
 0x11a   : > { %1373 = vmatprep.mubr.msk.f32.mxu0 %vm452_vm0, %v509_v1  ;;  %1453 = vmatprep.subr.bf16.mxu0 %v1915_v26 }
 0x11b   : > { %1387 = vmatprep.mubr.msk.f32.mxu1 %vm1916_vm1, %v1917_v27 }
 0x11d   : > { %1374 = vmatmul.mubr.msk.f32.vlgmr.msra.gmra.mrb[4].mxu0 %vm452_vm0, %v510_v12 }
 0x11e   : > { %1376 = vmatprep.mubr.msk.f32.mxu0 %vm452_vm0, %v511_v22 }
 0x121   : > { %1377 = vmatmul.mubr.msk.f32.gmra.mrb[6].mxu0 %vm452_vm0, %v512_v25 }
 0x122   : > { %1398 = vmatprep.mubr.msk.f32.mxu0 %vm1916_vm1, %v1917_v27 }
 0x1e6   : > { %v1347_v28 = vpop.f32.mrb[0].mxu0  ;;  %v1361_v29 = vpop.f32.mrb[0].mxu1 }
 0x1e7   : > { %v595_v30 = vpop.f32.mrb[1].mxu0  ;;  %v684_v31 = vpop.f32.mrb[1].mxu1 }
 0x1e8   : > { %v1460_v32 = vpack.c.bf16 %v1347_v28, %v595_v30  ;;  %v1448_v33 = vpack.c.bf16 %v1361_v29, %v684_v31 }
 0x1ea   : > { %1449 = vmatpush3.bf16.msra.mxu1 %v1448_v33 }
 0x1eb   : > { %1450 = vmatprep.subr.bf16.mxu1 %v1915_v26 }
 0x1ec   : > { %v1350_v34 = vpop.f32.mrb[2].mxu0  ;;  %v1364_v35 = vpop.f32.mrb[2].mxu1 }
 0x1ed   : > { %v605_v36 = vpop.f32.mrb[3].mxu0  ;;  %v694_v37 = vpop.f32.mrb[3].mxu1 }
 0x1ee   : > { %v1463_v38 = vpack.c.bf16 %v1350_v34, %v605_v36  ;;  %v1451_v39 = vpack.c.bf16 %v1364_v35, %v694_v37 }
 0x1f0   : > { %v1375_v40 = vpop.f32.mrb[4].mxu0  ;;  %1452 = vmatpush3.bf16.msra.mxu1 %v1451_v39 }
 0x1f1   : > { %v773_v42 = vpop.f32.mrb[5].mxu0  ;;  %1459 = vmatprep.subr.bf16.mxu1 %v1915_v26 }
 0x1f2   : > { %v1454_v43 = vpack.c.bf16 %v1375_v40, %v773_v42 }
 0x1f3   : > { %1388 = vmatmul.mubr.msk.f32.vlgmr.msra.gmra.mrb[4].mxu1 %vm452_vm0, %v792_v41 }
 0x1f4   : > { %v1378_v44 = vpop.f32.mrb[6].mxu0  ;;  %1455 = vmatpush3.bf16.msra.mxu0 %v1454_v43  ;;  %1461 = vmatpush3.bf16.msra.mxu1 %v1460_v32 }
 0x1f5   : > { %v783_v45 = vpop.f32.mrb[7].mxu0  ;;  %1456 = vmatprep.subr.bf16.mxu0 %v1915_v26  ;;  %1462 = vmatprep.subr.bf16.mxu1 %v1915_v26 }
 0x1f6   : > { %v1457_v46 = vpack.c.bf16 %v1378_v44, %v783_v45  ;;  %1409 = vmatprep.mubr.msk.f32.mxu1 %vm1916_vm1, %v1917_v27 }
 0x1f8   : > { %1458 = vmatpush3.bf16.msra.mxu0 %v1457_v46  ;;  %1464 = vmatpush3.bf16.msra.mxu1 %v1463_v38 }
 0x1f9   : > { %1465 = vmatprep.subr.bf16.mxu0 %v1915_v26 }
 0x1fb   : > { %1399 = vmatmul.mubr.msk.f32.vlgmr.msra.gmra.mrb[8].mxu0 %vm452_vm0, %v792_v41  ;;  %1410 = vmatmul.mubr.msk.f32.vlgmr.msra.gmra.mrb[6].mxu1 %vm452_vm0, %v936_v47 }
 0x1fc   : > { %1467 = vmatpush3.bf16.msra.mxu0 %v1460_v32  ;;  %1420 = vmatprep.mubr.msk.f32.mxu0 %vm1916_vm1, %v1917_v27 }
 0x1fd   : > { %1468 = vmatprep.subr.bf16.mxu0 %v1915_v26 }
 0x200   : > { %1470 = vmatpush3.bf16.msra.mxu0 %v1463_v38 }
 0x203   : > { %1421 = vmatmul.mubr.msk.f32.vlgmr.msra.gmra.mrb[10].mxu0 %vm452_vm0, %v1010_v48 }
 0x2c6   : > { %v862_v49 = vpop.f32.mrb[4].mxu1 }
 0x2c7   : > { %v1389_v50 = vpop.f32.mrb[5].mxu1  ;;  %v1084_v51 = vmul.f32 %v862_v49, %v862_v49 }
 0x2ce   : > { %v932_v52 = vpop.f32.mrb[8].mxu0  ;;  %v1006_v53 = vpop.f32.mrb[6].mxu1 }
 0x2cf   : > { %v1085_v54 = vmul.f32 %v932_v52, %v932_v52  ;;  %v1400_v55 = vpop.f32.mrb[9].mxu0  ;;  %v1087_v56 = vmul.f32 %v1006_v53, %v1006_v53  ;;  %v1411_v57 = vpop.f32.mrb[7].mxu1 }
 0x2d1   : > { %v1086_v58 = vadd.f32 %v1085_v54, %v1084_v51 }
 0x2d3   : > { %v1088_v59 = vadd.f32 %v1087_v56, %v1086_v58 }
 0x2d6   : > { %v1080_v60 = vpop.f32.mrb[10].mxu0 }
 0x2d7   : > { %v1089_v61 = vmul.f32 %v1080_v60, %v1080_v60  ;;  %v1422_v62 = vpop.f32.mrb[11].mxu0 }
 0x2d9   : > { %v1090_v63 = vadd.f32 %v1089_v61, %v1088_v59 }
 0x2db   : > { %1092 = vst [vmem:[%s439_s22] sm:$0xff] %v1090_v63 }
 0x2dc   : > { %1834 = shalt.err (!%p1831_p1)
}
 0x2dd   : > { %s1835_s25 = scalar_lea.hbm %s2376_s15, 128  ;;  %s1839_s23 = scalar_lea.hbm %s2428_s8, 256 }
 0x2de   : > { %p1836_p10 = scmp.ne.s32.totalorder %s2376_s15, %s1835_s25  ;;  %p1840_p0 = scmp.lt.u32.totalorder %s2376_s15, %s2428_s8 }
 0x2df   : > { %p1841_p6 = scmp.lt.u32.totalorder %s1839_s23, %s1835_s25  ;;  %p1843_p9 = scmp.lt.u32.totalorder %s1835_s25, %s2376_s15 }
 0x2e0   : > { %p1837_p11 = pnand %p1836_p10, %p2484_p4 }
 0x2e1   : > { %p1842_p8 = por %p1841_p6, %p1840_p0 }
 0x2e2   : > { %p1838_p13 = pneg %p1837_p11 }
 0x2e3   : > { %p1844_p5 = por %p1843_p9, %p1842_p8 }
 0x2e5   : > { %p1845_p3 = pnand %p1844_p5, %p1838_p13 }
 0x2e7   : > { %1848 = shalt.err (!%p1845_p3)
}
 0x2e8   : > { %1504 = dma.vmem_to_hbm [thread:$0]  (%p2484_p4), %s2378_s17, 128, %s2376_s15, %s1094_s26  }
 0x2e9 PF: > { %s2485_s13 = sld [smem:[#allocation25_spill]]  ;;  %s1119_s18 = sand.u32 1, %s1891_s27  }
 0x2ea   : > { %p2487_p2 = scmp.ge.s32.totalorder %s1903_s30, 2  ;;  %s1120_s24 = scalar_lea.sflag [#allocation4], %s1119_s18 }
 0x2ef   : > { %p2486_p12 = scmp.ne.s32.totalorder %s2485_s13, 0 }
 0x2f1   : > { %p1533_p7 = pnand %p2487_p2, %p2486_p12 }
 0x2f3   : > { %1886 = dma.done.wait (!%p1533_p7), %s1120_s24, 128  }
 0x2f4   : > { %1888 = vsyncadd (!%p1533_p7), %s1120_s24, 4294967168  ;;  %s2488_s30 = sld [smem:[#allocation23_spill]]  ;;  %s2489_s16 = sld [smem:[#allocation22_spill]] }
 0x2f5   : > { %s2490_s29 = sld [smem:[#allocation24_spill]]  ;;  %s2491_s27 = smov %s1895_s28 }
 0x2fa   : > { %p22_p1 = scmp.ge.s32.totalorder %s2488_s30, 4   ;;  %s2492_s28 = smov %s2489_s16 }
 0x2fc   :  { %24 = sbr.rel (!%p22_p1) target bundleno = 12 (0xc), region = 131 }
 0x303   :  { %1125 = vsyncpa [#allocation3], 1 }
 0x304   :  { %1127 = vsyncpa [#allocation3 + $0x1], 1 }
 0x305   :  { %1128 = vsyncpa [#allocation6], 1 }
 0x306   :  { %1129 = vsyncpa [#allocation9], 1 }
 0x307   :  { %1130 = vsyncpa [#allocation12], 1 }
 0x308   :  { %1131 = vsyncpa [#allocation4], 1 }
 0x309   :  { %1133 = vsyncpa [#allocation4 + $0x1], 1 }

</bundles_post_ra>
